<compile_context>
chip_gen: v5e
topology: v5e:2x2
jax: 0.10.0
libtpu: 0.0.40
codegen_flags: <defaults>
</compile_context>

<pallas_src>
import functools

import jax
import jax.numpy as jnp
from jax.experimental import pallas as pl
from jax.experimental.pallas import tpu as pltpu


def _round_up(x, m):
    return ((x + m - 1) // m) * m


def _lbhinge_rowsum_kernel(pred_ref, lab_ref, out_ref, *, threshold):
    """Per-row sum of hinged squared error.

    pred_ref / lab_ref : (row_blk, HW) tiles in native dtype
    out_ref            : (row_blk, 1) f32 row sums
    """
    pred = pred_ref[...].astype(jnp.float32)
    lab = lab_ref[...].astype(jnp.float32)
    # Fused hinge:  label < thr -> relu(pred) - 0 ; else -> pred - label
    diff = jnp.where(lab < threshold, jnp.maximum(pred, 0.0), pred - lab)
    out_ref[...] = jnp.sum(diff * diff, axis=-1, keepdims=True)


def lb_hinge_v2(prediction, label, valid_samples=None, threshold=None,
                return_per_sequence=False):
    """JAX/Pallas equivalent of LBHingev2.forward (default MSE error metric)."""
    assert prediction.ndim == 4 and label.ndim == 4
    thr = float(threshold) if threshold is not None else -100.0

    b1, b2, h, w = prediction.shape
    n, hw = b1 * b2, h * w
    pred2d = prediction.reshape(n, hw)      # native dtype; f32 cast is in-kernel
    lab2d = label.reshape(n, hw)

    # ---- tile sizing --------------------------------------------------------
    itemsize = max(pred2d.dtype.itemsize, lab2d.dtype.itemsize)
    sublane = 8 * max(1, 4 // itemsize)     # f32 -> 8, bf16 -> 16, int8 -> 32

    # Per-row VMEM footprint: two double-buffered native-dtype input rows plus
    # ~3 f32 intermediate rows (casts / diff) the kernel materializes.
    per_row_bytes = hw * (4 * itemsize + 12)
    budget_bytes = 8 * 1024 * 1024          # well under every chip's scoped default
    rows_fit = max(1, budget_bytes // per_row_bytes)
    cap_vmem = max(sublane, (min(rows_fit, 1024) // sublane) * sublane)

    # Grid: at least 4 steps (DMA/compute overlap + megacore) when the row
    # granularity allows, even step count so both v7x TCs get work, and enough
    # steps that each block fits the VMEM budget.
    max_blocks = pl.cdiv(n, sublane)        # finest split the layout allows
    steps = max(4, pl.cdiv(n, cap_vmem))
    if steps % 2:
        steps += 1
    steps = min(steps, max_blocks)
    row_blk = min(cap_vmem, _round_up(pl.cdiv(n, steps), sublane))
    grid_steps = pl.cdiv(n, row_blk)

    # ---- kernel launch ------------------------------------------------------
    kernel = functools.partial(_lbhinge_rowsum_kernel, threshold=thr)
    row_sums = pl.pallas_call(
        kernel,
        out_shape=jax.ShapeDtypeStruct((n, 1), jnp.float32),
        grid_spec=pl.GridSpec(
            grid=(grid_steps,),
            in_specs=[
                pl.BlockSpec((row_blk, hw), lambda i: (i, 0)),
                pl.BlockSpec((row_blk, hw), lambda i: (i, 0)),
            ],
            out_specs=pl.BlockSpec((row_blk, 1), lambda i: (i, 0)),
        ),
        compiler_params=pltpu.CompilerParams(
            # rows are independent -> let v7x shard the grid across its 2 TCs
            dimension_semantics=("parallel",)),
    )(pred2d, lab2d)

    row_sums = row_sums[:, 0]               # (N,) f32 per-map sums of sq. error

    # ---- valid-sample scaling + final reductions (tiny, plain JAX) ----------
    if valid_samples is not None:
        vs_f = valid_samples.astype(jnp.float32).reshape(-1)
        assert vs_f.size == n, "valid_samples must carry one weight per score map"
        # v^2 * sum((pred - target)^2) == sum((v*(pred - target))^2)  -- exact.
        row_sums = row_sums * vs_f * vs_f

    if return_per_sequence:
        # error_metric(reduction='none') followed by .mean((-2, -1));
        # no valid-count rescaling in this branch (matches the PyTorch module).
        return (row_sums / float(hw)).reshape(b1, b2)

    loss = row_sums.sum() / float(n * hw)   # nn.MSELoss(reduction='mean')
    if valid_samples is not None:
        loss = loss * float(vs_f.size) / (vs_f.sum() + 1e-12)
    return loss


def _lb_hinge_v2_ref(prediction, label, valid_samples, threshold, return_per_sequence):
    """Pure-JAX reference mirroring the PyTorch module (default MSE metric)."""
    thr = float(threshold) if threshold is not None else -100.0
    neg = (label < thr).astype(jnp.float32)
    pos = 1.0 - neg
    pred = neg * jnp.maximum(prediction, 0.0) + pos * prediction
    if valid_samples is not None:
        vs = valid_samples.astype(jnp.float32)
        vsb = vs.reshape(vs.shape + (1, 1))
        pred = pred * vsb
        lab = label * vsb
        err = (pred - pos * lab) ** 2
        if return_per_sequence:
            return err.mean((-2, -1))
        return err.mean() * vs.size / (vs.sum() + 1e-12)
    err = (pred - pos * label) ** 2
    if return_per_sequence:
        return err.mean((-2, -1))
    return err.mean()


if __name__ == "__main__":
    key = jax.random.PRNGKey(0)
    k_pred, k_lab, k_valid = jax.random.split(key, 3)

    # shapes consistent with pytracking score maps: (num_seq, num_img, H, W)
    # N=15, HW=361 -> exercises unaligned lane dim and a partial boundary block
    num_seq, num_img, H, W = 3, 5, 19, 19
    prediction = jax.random.normal(k_pred, (num_seq, num_img, H, W), dtype=jnp.float32)
    label = jax.random.uniform(k_lab, (num_seq, num_img, H, W),
                               dtype=jnp.float32, minval=-0.2, maxval=1.0)
    valid_samples = (jax.random.uniform(k_valid, (num_seq, num_img)) > 0.3)
    thr = 0.05

    loss = lb_hinge_v2(prediction, label, valid_samples=valid_samples, threshold=thr)
    loss_ps = lb_hinge_v2(prediction, label, valid_samples=valid_samples,
                          threshold=thr, return_per_sequence=True)
    loss_nv = lb_hinge_v2(prediction, label, threshold=thr)
    jax.block_until_ready((loss, loss_ps, loss_nv))

    # correctness check against the pure-JAX reference
    ref = _lb_hinge_v2_ref(prediction, label, valid_samples, thr, False)
    ref_ps = _lb_hinge_v2_ref(prediction, label, valid_samples, thr, True)
    ref_nv = _lb_hinge_v2_ref(prediction, label, None, thr, False)
    ok = (jnp.allclose(loss, ref, rtol=1e-4, atol=1e-5)
          and jnp.allclose(loss_ps, ref_ps, rtol=1e-4, atol=1e-5)
          and jnp.allclose(loss_nv, ref_nv, rtol=1e-4, atol=1e-5))
    if not bool(ok):
        raise AssertionError("Pallas LBHingev2 deviates from the JAX reference")

    print("KERNEL_OK")
</pallas_src>

<mosaic_0001>
module attributes {stable_mosaic.version = 11 : i64} {
  func.func @_lbhinge_rowsum_kernel(%arg0: i32, %arg1: memref<8x361xf32, #tpu.memory_space<vmem>>, %arg2: memref<8x361xf32, #tpu.memory_space<vmem>>, %arg3: memref<8x1xf32, #tpu.memory_space<vmem>>) attributes {dimension_semantics = [#tpu.dimension_semantics<parallel>], iteration_bounds = array<i64: 2>, scalar_prefetch = 0 : i64, scratch_operands = 0 : i64, tpu.core_type = #tpu.core_type<tc>, window_params = [{transform_indices = @transform_0, window_bounds = array<i64: 8, 361>}, {transform_indices = @transform_1, window_bounds = array<i64: 8, 361>}, {transform_indices = @transform_2, window_bounds = array<i64: 8, 1>}]} {
    %c0 = arith.constant 0 : index
    %c0_0 = arith.constant 0 : index
    %0 = vector.load %arg1[%c0, %c0_0] : memref<8x361xf32, #tpu.memory_space<vmem>>, vector<8x361xf32>
    %c0_1 = arith.constant 0 : index
    %c0_2 = arith.constant 0 : index
    %1 = vector.load %arg2[%c0_1, %c0_2] : memref<8x361xf32, #tpu.memory_space<vmem>>, vector<8x361xf32>
    %cst = arith.constant 5.000000e-02 : f32
    %2 = vector.broadcast %cst : f32 to vector<8x361xf32>
    %3 = arith.cmpf olt, %1, %2 : vector<8x361xf32>
    %cst_3 = arith.constant 0.000000e+00 : f32
    %4 = vector.broadcast %cst_3 : f32 to vector<8x361xf32>
    %5 = arith.maximumf %0, %4 : vector<8x361xf32>
    %6 = arith.subf %0, %1 : vector<8x361xf32>
    %7 = arith.select %3, %5, %6 : vector<8x361xi1>, vector<8x361xf32>
    %8 = arith.mulf %7, %7 : vector<8x361xf32>
    %cst_4 = arith.constant dense<0.000000e+00> : vector<8xf32>
    %9 = vector.multi_reduction <add>, %8, %cst_4 [1] : vector<8x361xf32> to vector<8xf32>
    %10 = vector.shape_cast %9 : vector<8xf32> to vector<8x1xf32>
    %c0_5 = arith.constant 0 : index
    %c0_6 = arith.constant 0 : index
    %11 = vector.load %arg3[%c0_5, %c0_6] : memref<8x1xf32, #tpu.memory_space<vmem>>, vector<8x1xf32>
    tpu.vector_store %arg3[%c0_5, %c0_6], %10 {strides = array<i32>} : memref<8x1xf32, #tpu.memory_space<vmem>>, vector<8x1xf32>,
    return
  }
  func.func @transform_0(%arg0: i32) -> (i32, i32) {
    %c0_i32 = arith.constant 0 : i32
    %c0_i32_0 = arith.constant 0 : i32
    return %arg0, %c0_i32 : i32, i32
  }
  func.func @transform_1(%arg0: i32) -> (i32, i32) {
    %c0_i32 = arith.constant 0 : i32
    %c0_i32_0 = arith.constant 0 : i32
    return %arg0, %c0_i32 : i32, i32
  }
  func.func @transform_2(%arg0: i32) -> (i32, i32) {
    %c0_i32 = arith.constant 0 : i32
    %c0_i32_0 = arith.constant 0 : i32
    return %arg0, %c0_i32 : i32, i32
  }
}

</mosaic_0001>

<bundles_post_ra>
// kernel: tpu_custom_call.1
= control target key start
LH: loop header
LB: loop body
LE: loop exit
PB: predicated region body
PF: predicated region fallthrough
CT: control target
= control target key end

     0   :  { %7 = vsyncpa [#allocation3], 0  ;;  %s614_s0 = inlined_call_operand.hbm [shape: f32[15,361], index: 0, kind: input, shape index: {}]   ;;  %s615_s1 = inlined_call_operand.hbm [shape: f32[15,361], index: 1, kind: input, shape index: {}]   ;;  %s616_s2 = inlined_call_operand.vmem [shape: f32[15,1], index: 2, kind: output, shape index: {}]  }
   0x1   :  { %9 = vsyncpa [#allocation3 + $0x1], 0 }
   0x2   :  { %10 = vsyncpa [#allocation5], 0 }
   0x3   :  { %12 = vsyncpa [#allocation5 + $0x1], 0  ;;  %s492_s9 = smov 0   ;;  %s494_s10 = smov 0  }
   0x4   :  { %s496_s11 = smov 0   ;;  %s498_s12 = smov 0  }
   0x5 LB: > { %s511_s13 = sadd.s32 4294967295, %s475_s12   ;;  %s514_s14 = sadd.s32 1, %s475_s12   ;;  %s475_s12 = sphi %s498_s12, %s623_s12   ;;  %s471_s11 = sphi %s496_s11, %s622_s11   ;;  %s467_s10 = sphi %s494_s10, %s621_s10   ;;  %s463_s9 = sphi %s492_s9, %s620_s9  }
   0x6   : > { %s22_s15 = ssub.s32 %s475_s12, %s514_s14  ;;  %s25_s16 = sadd.s32 1, %s471_s11 }
   0x7   : > { %p23_p0 = scmp.eq.s32.totalorder %s22_s15, 0  ;;  %p32_p1 = scmp.ne.s32.totalorder %s471_s11, %s467_s10 }
   0x8   : > { %p33_p2 = scmp.eq.s32.totalorder %s475_s12, 0  ;;  %p38_p3 = scmp.ne.s32.totalorder %s467_s10, %s463_s9 }
   0x9   : > { %s524_s17 = scalar_select %p23_p0, %s471_s11, %s25_s16  }
   0xa   : > { %p34_p4 = por %p33_p2, %p32_p1  ;;  %p39_p5 = scmp.eq.s32.totalorder %s511_s13, 0 }
   0xb   : > { %p344_p6 = scmp.lt.s32.totalorder %s475_s12, 2  ;;  %s533_s19 = sand.u32 1, %s471_s11  }
   0xc   : > { %p528_p7 = por %p39_p5, %p38_p3  ;;  %s328_s20 = smul.u32 24, %s533_s19 }
   0xd   : > { %s329_s21 = smul.u32 24, %s475_s12  ;;  %p537_p8 = pnand %p344_p6, %p34_p4 }
   0xe   : > { %p324_p9 = scmp.ge.s32.totalorder %s475_s12, 1  ;;  %s118_s26 = scalar_lea.vmem [#allocation2], %s328_s20 }
   0xf   : > { %s123_s25 = scalar_lea.hbm %s614_s0, %s329_s21  ;;  %s127_s27 = sshll.u32 %s118_s26, 4  ;;  %s128_s27 = int_to_ptr.vmem [resolvable:$true] %s127_s27 }
  0x10   : > { %s125_s28 = sshll.u32 %s123_s25, 4  ;;  %s115_s29 = scalar_lea.sflag [#allocation3], %s533_s19  ;;  %s126_s28 = int_to_ptr.hbm [resolvable:$true] %s125_s28 }
  0x11   : > { %s377_s30 = sshra.s32 %s126_s28, 4  ;;  %p381_p11 = pneg %p537_p8  ;;  %s378_s30 = int_to_ptr.hbm [resolvable:$true] %s377_s30 }
  0x12   : > { %s379_s3 = scalar_lea.hbm %s378_s30, 24  ;;  %s384_s6 = scalar_lea.hbm %s614_s0, 48 }
  0x13   : > { %p380_p10 = scmp.ne.s32.totalorder %s378_s30, %s379_s3  ;;  %p385_p0 = scmp.lt.s32.totalorder %s378_s30, %s614_s0 }
  0x14   : > { %p386_p1 = scmp.lt.s32.totalorder %s384_s6, %s379_s3 }
  0x15   : > { %p382_p12 = pnand %p381_p11, %p380_p10 }
  0x16   : > { %p387_p2 = por %p386_p1, %p385_p0 }
  0x17   : > { %p383_p13 = pneg %p382_p12 }
  0x19   : > { %p388_p3 = pnand %p387_p2, %p383_p13 }
  0x1b   : > { %391 = shalt.err (!%p388_p3)
}
  0x1c   : > { %340 = dma.hbm_to_vmem [thread:$0]  (!%p537_p8), %s126_s28, 384, %s128_s27, %s115_s29  }
  0x1d   : > { %p152_p4 = scmp.lt.s32.totalorder %s475_s12, 3  ;;  %s143_s16 = scalar_lea.hbm %s615_s1, %s329_s21 }
  0x1e   : > { %s145_s24 = sshll.u32 %s143_s16, 4  ;;  %s138_s25 = scalar_lea.vmem [#allocation4], %s328_s20  ;;  %s146_s24 = int_to_ptr.hbm [resolvable:$true] %s145_s24 }
  0x1f   : > { %p567_p5 = pnand %p324_p9, %p152_p4  ;;  %s147_s26 = sshll.u32 %s138_s25, 4  ;;  %s148_s26 = int_to_ptr.vmem [resolvable:$true] %s147_s26 }
  0x20   : > { %s135_s30 = scalar_lea.sflag [#allocation5], %s533_s19  ;;  %s407_s3 = sshra.s32 %s146_s24, 4  ;;  %s408_s3 = int_to_ptr.hbm [resolvable:$true] %s407_s3 }
  0x21   : > { %s409_s27 = scalar_lea.hbm %s408_s3, 24  ;;  %s414_s28 = scalar_lea.hbm %s615_s1, 48 }
  0x22   : > { %p410_p6 = scmp.ne.s32.totalorder %s408_s3, %s409_s27  ;;  %p415_p9 = scmp.lt.s32.totalorder %s408_s3, %s615_s1 }
  0x23   : > { %p416_p13 = scmp.lt.s32.totalorder %s414_s28, %s409_s27 }
  0x24   : > { %p412_p10 = pnand %p410_p6, %p381_p11 }
  0x25   : > { %p417_p0 = por %p416_p13, %p415_p9 }
  0x26   : > { %p413_p12 = pneg %p412_p10 }
  0x28   : > { %p418_p1 = pnand %p417_p0, %p413_p12 }
  0x2a   : > { %421 = shalt.err (!%p418_p1)
}
  0x2b   : > { %343 = dma.hbm_to_vmem [thread:$0]  (!%p537_p8), %s146_s24, 384, %s148_s26, %s135_s30  }
  0x2c   : > { %156 = sbr.rel (%p567_p5) target bundleno = 181 (0xb5), region = 28  ;;  %s158_s19 = sand.u32 (!%p567_p5), 1, %s467_s10  }
  0x2d   : > { %s332_s20 = smul.u32 (!%p567_p5), 24, %s158_s19  ;;  %s159_s5 = scalar_lea.sflag (!%p567_p5), [#allocation3], %s158_s19 }
  0x2f   : > { %s162_s6 = scalar_lea.vmem (!%p567_p5), [#allocation2], %s332_s20 }
  0x31   : > { %454 = dma.done.wait (%p528_p7), %s159_s5, 384  }
  0x32   : > { %456 = vsyncadd (%p528_p7), %s159_s5, 4294966912  ;;  %s169_s7 = scalar_lea.sflag [#allocation5], %s158_s19  ;;  %s172_s8 = scalar_lea.vmem [#allocation4], %s332_s20 }
  0x33   : > { %458 = dma.done.wait (%p528_p7), %s169_s7, 384  }
  0x34   : > { %460 = vsyncadd (%p528_p7), %s169_s7, 4294966912  ;;  %v202_v0 = vld [vmem:[%s162_s6] sm:$0xff]  ;;  %v203_v1 = vld [vmem:[%s162_s6 + $0x8] sm:$0xff]  ;;  %vm224_vm3 = vcmask 859136   ;;  %p198_p7 = scmp.lt.s32.totalorder %s511_s13, 1  ;;  %vm229_vm4 = vcmask 7168  }
  0x35   : > { %v204_v2 = vld [vmem:[%s162_s6 + $0x10] sm:$0xff]  ;;  %v206_v4 = vld [vmem:[%s172_s8 + $0x8] sm:$0xff]  ;;  %v207_v5 = vld [vmem:[%s172_s8 + $0x10] sm:$0xff]  ;;  %v211_v6 = vmax.f32 %v202_v0, 0.0  ;;  %v212_v7 = vmax.f32 %v203_v1, 0.0 }
  0x36   : > { %v205_v3 = vld [vmem:[%s172_s8] sm:$0xff]  ;;  %v213_v8 = vmax.f32 %v204_v2, 0.0  ;;  %vm209_vm1 = vcmp.lt.f32.partialorder %v206_v4, 0.05  ;;  %vm210_vm2 = vcmp.lt.f32.partialorder %v207_v5, 0.05  ;;  %v215_v10 = vsub.f32 %v203_v1, %v206_v4 }
  0x37   : > { %vm208_vm0 = vcmp.lt.f32.partialorder %v205_v3, 0.05  ;;  %v214_v9 = vsub.f32 %v202_v0, %v205_v3  ;;  %v216_v11 = vsub.f32 %v204_v2, %v207_v5  ;;  %s625_s13 = smov (!%p198_p7, %s511_s13), 1 }
  0x38   : > { %v218_v13 = vsel %vm209_vm1, %v212_v7, %v215_v10  ;;  %s325_s18 = sshll.u32 %s625_s13, 3 }
  0x39   : > { %v217_v12 = vsel %vm208_vm0, %v211_v6, %v214_v9  ;;  %v219_v14 = vsel %vm210_vm2, %v213_v8, %v216_v11  ;;  %v221_v16 = vmul.f32 %v218_v13, %v218_v13  ;;  %s201_s15 = scalar_lea.vmem %s616_s2, %s325_s18 }
  0x3a   : > { %v220_v15 = vmul.f32 %v217_v12, %v217_v12  ;;  %v222_v17 = vmul.f32 %v219_v14, %v219_v14 }
  0x3c   : > { %v223_v18 = vadd.f32 %v221_v16, %v220_v15  ;;  %v225_v19 = vsel %vm224_vm3, %v222_v17, 0.0 }
  0x3e   : > { %v226_v20 = vadd.f32 %v225_v19, %v223_v18 }
  0x40   : > { %227 = vadd.xlane.f32.xlu0 %v226_v20 }
  0xb3   : > { %v228_v21 = vpop.xlane.xlu0 %227 }
  0xb4   : > { %230 = vst.msk [vmem:[%s201_s15] sm:$0xff] %vm229_vm4, %v228_v21 }
  0xb5 PF: > { %p15_p8 = scmp.ge.s32.totalorder %s514_s14, 4   ;;  %s620_s9 = smov %s467_s10 }
  0xb6   : > { %s621_s10 = smov %s471_s11  ;;  %s622_s11 = smov %s524_s17 }
  0xb7   : > { %s623_s12 = smov %s514_s14  ;;  %17 = sbr.rel (!%p15_p8) target bundleno = 5 (0x5), region = 81 }
  0xbc   :  { %250 = vsyncpa [#allocation3], 1 }
  0xbd   :  { %252 = vsyncpa [#allocation3 + $0x1], 1 }
  0xbe   :  { %253 = vsyncpa [#allocation5], 1 }
  0xbf   :  { %255 = vsyncpa [#allocation5 + $0x1], 1 }

</bundles_post_ra>
